<compile_context>
chip_gen: v7x
topology: tpu7x:2x2x1
jax: 0.10.0
libtpu: 0.0.40
codegen_flags: <defaults>
</compile_context>

<pallas_src>
import functools

import jax
import jax.numpy as jnp
from jax.experimental import pallas as pl
from jax.experimental.pallas import tpu as pltpu

HIDDEN = 100          # logical hidden width (PyTorch module)
HIDDEN_PAD = 128      # lane-dense padded hidden width
NEG_SLOPE = 0.01      # torch leaky_relu default
_SMALL_K = 8          # below this, layer-1 matmul runs on the VPU, not MXU
TB_MAX = 1024         # max rows per batch tile (sweep 512-1024; VMEM headroom is huge)


def _round_up(x, m):
    return (x + m - 1) // m * m


def _leaky_relu(z):
    return jnp.where(z > 0, z, NEG_SLOPE * z)


def mlp_kernel(x_ref,
               w1_ref, b1_ref,
               w2_ref, b2_ref,
               w3_ref, b3_ref,
               w4_ref, b4_ref,
               o_ref, *, vpu_layer1):
    x = x_ref[...]                                            # (TB, in_dim) f32

    if vpu_layer1:
        # K is tiny (e.g. 2): broadcast FMAs on the VPU avoid an MXU round-trip.
        # Built as one fused expression (no accumulating Python loop).
        w1 = w1_ref[...].astype(jnp.float32)                  # (in_dim, 128)
        terms = [x[:, k:k + 1] * w1[k:k + 1, :] for k in range(x.shape[1])]
        z1 = functools.reduce(jnp.add, terms, b1_ref[...])    # (TB, 128)
    else:
        z1 = jnp.dot(x.astype(jnp.bfloat16), w1_ref[...],
                     preferred_element_type=jnp.float32) + b1_ref[...]
    h1 = _leaky_relu(z1)

    z2 = jnp.dot(h1.astype(jnp.bfloat16), w2_ref[...],
                 preferred_element_type=jnp.float32) + b2_ref[...]
    h2 = _leaky_relu(z2)

    z3 = jnp.dot(h2.astype(jnp.bfloat16), w3_ref[...],
                 preferred_element_type=jnp.float32) + b3_ref[...]
    h3 = _leaky_relu(z3)

    # Narrow final layer: (TB, 128) x (128, out_dim) -> only out_dim f32
    # columns are ever written back to HBM.
    out = jnp.dot(h3.astype(jnp.bfloat16), w4_ref[...],
                  preferred_element_type=jnp.float32) + b4_ref[...]
    o_ref[...] = out.astype(o_ref.dtype)


@jax.jit
def _forward(x, pparams):
    w1, b1, w2, b2, w3, b3, w4, b4 = pparams
    batch, in_dim = x.shape
    out_dim = w4.shape[1]

    if batch <= 128:
        # Latency path (RL inference): one grid step; block dims equal the full
        # array dims, so no input pad and no output slice are needed.
        tb = batch
        padded_batch = batch
    else:
        # Throughput path: fat tiles (up to TB_MAX rows, multiple of 8) but at
        # least 2 blocks so both TensorCores are used on v7x.
        tb = min(TB_MAX, _round_up(-(-batch // 2), 8))
        padded_batch = _round_up(batch, tb)

    if padded_batch != batch:
        x = jnp.pad(x, ((0, padded_batch - batch), (0, 0)))
    grid = (padded_batch // tb,)

    kernel = functools.partial(mlp_kernel, vpu_layer1=(in_dim <= _SMALL_K))

    def resident(shape):
        # Constant index_map: weights/biases are DMA'd once and stay
        # VMEM-resident across all grid steps.
        return pl.BlockSpec(shape, lambda i: (0, 0))

    out = pl.pallas_call(
        kernel,
        out_shape=jax.ShapeDtypeStruct((padded_batch, out_dim), jnp.float32),
        grid=grid,
        in_specs=[
            pl.BlockSpec((tb, in_dim), lambda i: (i, 0)),       # activations
            resident((in_dim, HIDDEN_PAD)), resident((1, HIDDEN_PAD)),
            resident((HIDDEN_PAD, HIDDEN_PAD)), resident((1, HIDDEN_PAD)),
            resident((HIDDEN_PAD, HIDDEN_PAD)), resident((1, HIDDEN_PAD)),
            resident((HIDDEN_PAD, out_dim)), resident((1, out_dim)),
        ],
        out_specs=pl.BlockSpec((tb, out_dim), lambda i: (i, 0)),
        compiler_params=pltpu.CompilerParams(
            dimension_semantics=("parallel",)),
    )(x, w1, b1, w2, b2, w3, b3, w4, b4)

    if padded_batch != batch:
        out = out[:batch]
    return out


def network_forward(x, prepared_params):
    # Reproduce the torch.Size([2]) special-case: a bare 2-vector -> (1, 2).
    if x.ndim == 1 and x.shape[0] == 2:
        x = x.reshape(1, -1)
    return _forward(x, prepared_params)


# ---------------------------------------------------------------------------
# Parameter construction (PyTorch-equivalent init) and padding/casting.
# ---------------------------------------------------------------------------

def init_linear(key, fan_in, fan_out):
    """PyTorch nn.Linear default init: U(-1/sqrt(fan_in), 1/sqrt(fan_in)).

    Stored directly as (in_features, out_features) for x @ W layout
    (equivalent to transposing the PyTorch (out, in) weight)."""
    kw, kb = jax.random.split(key)
    bound = 1.0 / jnp.sqrt(jnp.float32(fan_in))
    w = jax.random.uniform(kw, (fan_in, fan_out), jnp.float32, -bound, bound)
    b = jax.random.uniform(kb, (1, fan_out), jnp.float32, -bound, bound)
    return w, b


def init_network(key, input_dimension, output_dimension):
    k1, k2, k3, k4 = jax.random.split(key, 4)
    return (
        init_linear(k1, input_dimension, HIDDEN),
        init_linear(k2, HIDDEN, HIDDEN),
        init_linear(k3, HIDDEN, HIDDEN),
        init_linear(k4, HIDDEN, output_dimension),
    )


def prepare_params(params):
    """Zero-pad hidden dims to 128, keep output dim narrow, cast weights to bf16."""
    (w1, b1), (w2, b2), (w3, b3), (w4, b4) = params
    in_dim = w1.shape[0]
    out_dim = w4.shape[1]

    def padw(w, rows, cols):
        return jnp.pad(
            w, ((0, rows - w.shape[0]), (0, cols - w.shape[1]))
        ).astype(jnp.bfloat16)

    def padb(b, cols):
        return jnp.pad(b, ((0, 0), (0, cols - b.shape[1]))).astype(jnp.float32)

    return (
        padw(w1, in_dim, HIDDEN_PAD), padb(b1, HIDDEN_PAD),
        padw(w2, HIDDEN_PAD, HIDDEN_PAD), padb(b2, HIDDEN_PAD),
        padw(w3, HIDDEN_PAD, HIDDEN_PAD), padb(b3, HIDDEN_PAD),
        padw(w4, HIDDEN_PAD, out_dim), padb(b4, out_dim),   # output kept narrow
    )


def ref_forward(x, params):
    """Pure-JAX f32 reference of the PyTorch module."""
    (w1, b1), (w2, b2), (w3, b3), (w4, b4) = params
    h = x
    for w, b in ((w1, b1), (w2, b2), (w3, b3)):
        h = jax.nn.leaky_relu(h @ w + b, NEG_SLOPE)
    return h @ w4 + b4


if __name__ == "__main__":
    key = jax.random.PRNGKey(0)
    k_params, k_x, k_big, k_ragged = jax.random.split(key, 4)

    input_dimension = 2    # maze state = (row, col)
    output_dimension = 4   # 4 discrete actions

    params = init_network(k_params, input_dimension, output_dimension)
    pparams = prepare_params(params)

    # Small-batch forward (hot RL-inference path: one grid step, no pad/slice).
    x = jax.random.uniform(k_x, (2, input_dimension), jnp.float32)
    out = network_forward(x, pparams)
    jax.block_until_ready(out)
    assert out.shape == (2, output_dimension)
    assert jnp.allclose(out, ref_forward(x, params), atol=5e-2, rtol=5e-2), \
        "small-batch mismatch vs f32 reference"

    # 1-D shape-(2,) special case from the torch forward.
    x1 = jax.random.uniform(jax.random.PRNGKey(1), (2,), jnp.float32)
    out1 = network_forward(x1, pparams)
    jax.block_until_ready(out1)
    assert out1.shape == (1, output_dimension)
    assert jnp.allclose(out1, ref_forward(x1.reshape(1, -1), params),
                        atol=5e-2, rtol=5e-2), "1-D case mismatch"

    # Batch > 128: gridded path, 2 blocks (dual-TC on v7x), weights VMEM-resident.
    xb = jax.random.uniform(k_big, (256, input_dimension), jnp.float32)
    outb = network_forward(xb, pparams)
    jax.block_until_ready(outb)
    assert outb.shape == (256, output_dimension)
    assert jnp.allclose(outb, ref_forward(xb, params), atol=5e-2, rtol=5e-2), \
        "large-batch mismatch vs f32 reference"

    # Ragged batch: exercises the pad + [:batch] slice fallback.
    xr = jax.random.uniform(k_ragged, (300, input_dimension), jnp.float32)
    outr = network_forward(xr, pparams)
    jax.block_until_ready(outr)
    assert outr.shape == (300, output_dimension)
    assert jnp.allclose(outr, ref_forward(xr, params), atol=5e-2, rtol=5e-2), \
        "ragged-batch mismatch vs f32 reference"

    print("KERNEL_OK")
</pallas_src>

<mosaic_0001>
module attributes {stable_mosaic.version = 11 : i64} {
  func.func @mlp_kernel(%arg0: i32, %arg1: memref<2x2xf32, #tpu.memory_space<vmem>>, %arg2: memref<2x128xbf16, #tpu.memory_space<vmem>>, %arg3: memref<1x128xf32, #tpu.memory_space<vmem>>, %arg4: memref<128x128xbf16, #tpu.memory_space<vmem>>, %arg5: memref<1x128xf32, #tpu.memory_space<vmem>>, %arg6: memref<128x128xbf16, #tpu.memory_space<vmem>>, %arg7: memref<1x128xf32, #tpu.memory_space<vmem>>, %arg8: memref<128x4xbf16, #tpu.memory_space<vmem>>, %arg9: memref<1x4xf32, #tpu.memory_space<vmem>>, %arg10: memref<2x4xf32, #tpu.memory_space<vmem>>) attributes {dimension_semantics = [#tpu.dimension_semantics<parallel>], iteration_bounds = array<i64: 1>, scalar_prefetch = 0 : i64, scratch_operands = 0 : i64, tpu.core_type = #tpu.core_type<tc>, window_params = [{transform_indices = @transform_0, window_bounds = array<i64: 2, 2>}, {pipeline_mode = #tpu.pipeline_mode<synchronous>, transform_indices = @transform_1, window_bounds = array<i64: 2, 128>}, {pipeline_mode = #tpu.pipeline_mode<synchronous>, transform_indices = @transform_2, window_bounds = array<i64: 1, 128>}, {pipeline_mode = #tpu.pipeline_mode<synchronous>, transform_indices = @transform_3, window_bounds = array<i64: 128, 128>}, {pipeline_mode = #tpu.pipeline_mode<synchronous>, transform_indices = @transform_4, window_bounds = array<i64: 1, 128>}, {pipeline_mode = #tpu.pipeline_mode<synchronous>, transform_indices = @transform_5, window_bounds = array<i64: 128, 128>}, {pipeline_mode = #tpu.pipeline_mode<synchronous>, transform_indices = @transform_6, window_bounds = array<i64: 1, 128>}, {pipeline_mode = #tpu.pipeline_mode<synchronous>, transform_indices = @transform_7, window_bounds = array<i64: 128, 4>}, {pipeline_mode = #tpu.pipeline_mode<synchronous>, transform_indices = @transform_8, window_bounds = array<i64: 1, 4>}, {transform_indices = @transform_9, window_bounds = array<i64: 2, 4>}]} {
    %c0 = arith.constant 0 : index
    %c0_0 = arith.constant 0 : index
    %0 = vector.load %arg1[%c0, %c0_0] : memref<2x2xf32, #tpu.memory_space<vmem>>, vector<2x2xf32>
    %c0_1 = arith.constant 0 : index
    %c0_2 = arith.constant 0 : index
    %1 = vector.load %arg2[%c0_1, %c0_2] : memref<2x128xbf16, #tpu.memory_space<vmem>>, vector<2x128xbf16>
    %2 = arith.extf %1 : vector<2x128xbf16> to vector<2x128xf32>
    %3 = vector.extract_strided_slice %0 {offsets = [0, 0], sizes = [2, 1], strides = [1, 1]} : vector<2x2xf32> to vector<2x1xf32>
    %4 = vector.extract_strided_slice %2 {offsets = [0, 0], sizes = [1, 128], strides = [1, 1]} : vector<2x128xf32> to vector<1x128xf32>
    %5 = vector.broadcast %3 : vector<2x1xf32> to vector<2x128xf32>
    %6 = vector.broadcast %4 : vector<1x128xf32> to vector<2x128xf32>
    %7 = arith.mulf %5, %6 : vector<2x128xf32>
    %8 = vector.extract_strided_slice %0 {offsets = [0, 1], sizes = [2, 1], strides = [1, 1]} : vector<2x2xf32> to vector<2x1xf32>
    %9 = vector.extract_strided_slice %2 {offsets = [1, 0], sizes = [1, 128], strides = [1, 1]} : vector<2x128xf32> to vector<1x128xf32>
    %10 = vector.broadcast %8 : vector<2x1xf32> to vector<2x128xf32>
    %11 = vector.broadcast %9 : vector<1x128xf32> to vector<2x128xf32>
    %12 = arith.mulf %10, %11 : vector<2x128xf32>
    %c0_3 = arith.constant 0 : index
    %c0_4 = arith.constant 0 : index
    %13 = vector.load %arg3[%c0_3, %c0_4] : memref<1x128xf32, #tpu.memory_space<vmem>>, vector<1x128xf32>
    %14 = vector.broadcast %13 : vector<1x128xf32> to vector<2x128xf32>
    %15 = arith.addf %14, %7 : vector<2x128xf32>
    %16 = arith.addf %15, %12 : vector<2x128xf32>
    %cst = arith.constant 0.000000e+00 : f32
    %17 = vector.broadcast %cst : f32 to vector<2x128xf32>
    %18 = arith.cmpf ogt, %16, %17 : vector<2x128xf32>
    %cst_5 = arith.constant 0.00999999977 : f32
    %19 = vector.broadcast %cst_5 : f32 to vector<2x128xf32>
    %20 = arith.mulf %19, %16 : vector<2x128xf32>
    %21 = arith.select %18, %16, %20 : vector<2x128xi1>, vector<2x128xf32>
    %22 = arith.truncf %21 : vector<2x128xf32> to vector<2x128xbf16>
    %c0_6 = arith.constant 0 : index
    %c0_7 = arith.constant 0 : index
    %23 = vector.load %arg4[%c0_6, %c0_7] : memref<128x128xbf16, #tpu.memory_space<vmem>>, vector<128x128xbf16>
    %cst_8 = arith.constant dense<0.000000e+00> : vector<2x128xf32>
    %24 = tpu.matmul %22, %23, %cst_8 {dimension_numbers = #tpu.dot_dimension_numbers<[1], [0], [0], [1], [0, 0, 1, 1], [], []>} : vector<2x128xbf16>, vector<128x128xbf16>, vector<2x128xf32> -> vector<2x128xf32>
    %c0_9 = arith.constant 0 : index
    %c0_10 = arith.constant 0 : index
    %25 = vector.load %arg5[%c0_9, %c0_10] : memref<1x128xf32, #tpu.memory_space<vmem>>, vector<1x128xf32>
    %26 = vector.broadcast %25 : vector<1x128xf32> to vector<2x128xf32>
    %27 = arith.addf %24, %26 : vector<2x128xf32>
    %cst_11 = arith.constant 0.000000e+00 : f32
    %28 = vector.broadcast %cst_11 : f32 to vector<2x128xf32>
    %29 = arith.cmpf ogt, %27, %28 : vector<2x128xf32>
    %cst_12 = arith.constant 0.00999999977 : f32
    %30 = vector.broadcast %cst_12 : f32 to vector<2x128xf32>
    %31 = arith.mulf %30, %27 : vector<2x128xf32>
    %32 = arith.select %29, %27, %31 : vector<2x128xi1>, vector<2x128xf32>
    %33 = arith.truncf %32 : vector<2x128xf32> to vector<2x128xbf16>
    %c0_13 = arith.constant 0 : index
    %c0_14 = arith.constant 0 : index
    %34 = vector.load %arg6[%c0_13, %c0_14] : memref<128x128xbf16, #tpu.memory_space<vmem>>, vector<128x128xbf16>
    %cst_15 = arith.constant dense<0.000000e+00> : vector<2x128xf32>
    %35 = tpu.matmul %33, %34, %cst_15 {dimension_numbers = #tpu.dot_dimension_numbers<[1], [0], [0], [1], [0, 0, 1, 1], [], []>} : vector<2x128xbf16>, vector<128x128xbf16>, vector<2x128xf32> -> vector<2x128xf32>
    %c0_16 = arith.constant 0 : index
    %c0_17 = arith.constant 0 : index
    %36 = vector.load %arg7[%c0_16, %c0_17] : memref<1x128xf32, #tpu.memory_space<vmem>>, vector<1x128xf32>
    %37 = vector.broadcast %36 : vector<1x128xf32> to vector<2x128xf32>
    %38 = arith.addf %35, %37 : vector<2x128xf32>
    %cst_18 = arith.constant 0.000000e+00 : f32
    %39 = vector.broadcast %cst_18 : f32 to vector<2x128xf32>
    %40 = arith.cmpf ogt, %38, %39 : vector<2x128xf32>
    %cst_19 = arith.constant 0.00999999977 : f32
    %41 = vector.broadcast %cst_19 : f32 to vector<2x128xf32>
    %42 = arith.mulf %41, %38 : vector<2x128xf32>
    %43 = arith.select %40, %38, %42 : vector<2x128xi1>, vector<2x128xf32>
    %44 = arith.truncf %43 : vector<2x128xf32> to vector<2x128xbf16>
    %c0_20 = arith.constant 0 : index
    %c0_21 = arith.constant 0 : index
    %45 = vector.load %arg8[%c0_20, %c0_21] : memref<128x4xbf16, #tpu.memory_space<vmem>>, vector<128x4xbf16>
    %cst_22 = arith.constant dense<0.000000e+00> : vector<2x4xf32>
    %46 = tpu.matmul %44, %45, %cst_22 {dimension_numbers = #tpu.dot_dimension_numbers<[1], [0], [0], [1], [0, 0, 1, 1], [], []>} : vector<2x128xbf16>, vector<128x4xbf16>, vector<2x4xf32> -> vector<2x4xf32>
    %c0_23 = arith.constant 0 : index
    %c0_24 = arith.constant 0 : index
    %47 = vector.load %arg9[%c0_23, %c0_24] : memref<1x4xf32, #tpu.memory_space<vmem>>, vector<1x4xf32>
    %48 = vector.broadcast %47 : vector<1x4xf32> to vector<2x4xf32>
    %49 = arith.addf %46, %48 : vector<2x4xf32>
    %c0_25 = arith.constant 0 : index
    %c0_26 = arith.constant 0 : index
    %50 = vector.load %arg10[%c0_25, %c0_26] : memref<2x4xf32, #tpu.memory_space<vmem>>, vector<2x4xf32>
    tpu.vector_store %arg10[%c0_25, %c0_26], %49 {strides = array<i32>} : memref<2x4xf32, #tpu.memory_space<vmem>>, vector<2x4xf32>,
    return
  }
  func.func @transform_0(%arg0: i32) -> (i32, i32) {
    %c0_i32 = arith.constant 0 : i32
    %c0_i32_0 = arith.constant 0 : i32
    return %arg0, %c0_i32 : i32, i32
  }
  func.func @transform_1(%arg0: i32) -> (i32, i32) {
    %c0_i32 = arith.constant 0 : i32
    %c0_i32_0 = arith.constant 0 : i32
    %c0_i32_1 = arith.constant 0 : i32
    return %c0_i32, %c0_i32_0 : i32, i32
  }
  func.func @transform_2(%arg0: i32) -> (i32, i32) {
    %c0_i32 = arith.constant 0 : i32
    %c0_i32_0 = arith.constant 0 : i32
    %c0_i32_1 = arith.constant 0 : i32
    return %c0_i32, %c0_i32_0 : i32, i32
  }
  func.func @transform_3(%arg0: i32) -> (i32, i32) {
    %c0_i32 = arith.constant 0 : i32
    %c0_i32_0 = arith.constant 0 : i32
    %c0_i32_1 = arith.constant 0 : i32
    return %c0_i32, %c0_i32_0 : i32, i32
  }
  func.func @transform_4(%arg0: i32) -> (i32, i32) {
    %c0_i32 = arith.constant 0 : i32
    %c0_i32_0 = arith.constant 0 : i32
    %c0_i32_1 = arith.constant 0 : i32
    return %c0_i32, %c0_i32_0 : i32, i32
  }
  func.func @transform_5(%arg0: i32) -> (i32, i32) {
    %c0_i32 = arith.constant 0 : i32
    %c0_i32_0 = arith.constant 0 : i32
    %c0_i32_1 = arith.constant 0 : i32
    return %c0_i32, %c0_i32_0 : i32, i32
  }
  func.func @transform_6(%arg0: i32) -> (i32, i32) {
    %c0_i32 = arith.constant 0 : i32
    %c0_i32_0 = arith.constant 0 : i32
    %c0_i32_1 = arith.constant 0 : i32
    return %c0_i32, %c0_i32_0 : i32, i32
  }
  func.func @transform_7(%arg0: i32) -> (i32, i32) {
    %c0_i32 = arith.constant 0 : i32
    %c0_i32_0 = arith.constant 0 : i32
    %c0_i32_1 = arith.constant 0 : i32
    return %c0_i32, %c0_i32_0 : i32, i32
  }
  func.func @transform_8(%arg0: i32) -> (i32, i32) {
    %c0_i32 = arith.constant 0 : i32
    %c0_i32_0 = arith.constant 0 : i32
    %c0_i32_1 = arith.constant 0 : i32
    return %c0_i32, %c0_i32_0 : i32, i32
  }
  func.func @transform_9(%arg0: i32) -> (i32, i32) {
    %c0_i32 = arith.constant 0 : i32
    %c0_i32_0 = arith.constant 0 : i32
    return %arg0, %c0_i32 : i32, i32
  }
}

</mosaic_0001>

<bundles_post_ra>
// kernel: _forward.1
= control target key start
LH: loop header
LB: loop body
LE: loop exit
PB: predicated region body
PF: predicated region fallthrough
CT: control target
= control target key end

     0   :  { %14 = vsyncpa [#allocation3], 0  ;;  %s816_s0 = inlined_call_operand.vmem [shape: f32[2,2], index: 0, kind: input, shape index: {}]   ;;  %s817_s1 = inlined_call_operand.vmem [shape: bf16[2,128], index: 1, kind: input, shape index: {}]   ;;  %s818_s2 = inlined_call_operand.vmem [shape: f32[1,128], index: 2, kind: input, shape index: {}]   ;;  %s819_s3 = inlined_call_operand.vmem [shape: bf16[128,128], index: 3, kind: input, shape index: {}]   ;;  %s820_s4 = inlined_call_operand.vmem [shape: f32[1,128], index: 4, kind: input, shape index: {}]   ;;  %s821_s5 = inlined_call_operand.hbm [shape: bf16[128,128], index: 5, kind: input, shape index: {}]   ;;  %s822_s6 = inlined_call_operand.vmem [shape: f32[1,128], index: 6, kind: input, shape index: {}]   ;;  %s823_s7 = inlined_call_operand.vmem [shape: bf16[128,4], index: 7, kind: input, shape index: {}]   ;;  %s824_s8 = inlined_call_operand.vmem [shape: f32[1,4], index: 8, kind: input, shape index: {}]   ;;  %s825_s9 = inlined_call_operand.hbm [shape: f32[2,4], index: 9, kind: output, shape index: {}]  }
   0x1   :  { %15 = vsyncpa [#allocation4], 0  ;;  %s638_s30 = smov [#allocation2]   ;;  %s590_s13 = scalar_lea.hbm %s821_s5, 1024 }
   0x2   :  { %s31_s10 = sshll.u32 %s638_s30, 4  ;;  %p591_p0 = scmp.ne.s32.totalorder %s821_s5, %s590_s13  ;;  %s32_s10 = int_to_ptr.vmem [resolvable:$true] %s31_s10 }
   0x3   :  { %p594_p1 = scmp.lt.u32.totalorder %s590_s13, %s821_s5 }
   0x5   :  { %p596_p2 = pnand %p594_p1, %p591_p0 }
   0x7   :  { %599 = shalt.err (!%p596_p2)
}
   0x8   :  { %s600_s18 = scalar_lea.vmem %s32_s10, 1024  ;;  %p605_p4 = scmp.lt.s32.totalorder %s32_s10, %s32_s10 }
   0x9   :  { %p601_p3 = scmp.ne.s32.totalorder %s32_s10, %s600_s18  ;;  %p606_p5 = scmp.lt.s32.totalorder %s600_s18, %s600_s18 }
   0xb   :  { %p607_p6 = por %p606_p5, %p605_p4 }
   0xd   :  { %p608_p7 = pnand %p607_p6, %p601_p3 }
   0xf   :  { %611 = shalt.err (!%p608_p7)
}
  0x10   :  { %s639_s19 = smov 64   ;;  %s640_s20 = smov 4  }
  0x11   :  { %37 = dma.hbm_to_vmem [thread:$0]  %s821_s5, 1024, %s32_s10, [#allocation3], %s639_s19, %s639_s19, %s640_s20  }
  0x12   :  { %634 = dma.done.wait [#allocation3], 1024  }
  0x13   :  { %635 = vsyncadd [#allocation3], 4294966272  ;;  %v641_v0 = vmov 0   ;;  %v642_v1 = vmov 0.0   ;;  %v48_v2 = vld [vmem:[%s816_s0] sm:$0x3]  ;;  %v56_v18 = vlaneseq }
  0x14   :  { %564 = vset.pattern.permute.xlu0 %v641_v0  ;;  %496 = vmatprep.subr.bf16.mxu0 %v642_v1  ;;  %v566_v3 = vld [vmem:[%s819_s3] sm:$0xff]   ;;  %v567_v4 = vld [vmem:[%s819_s3 + $0x8] sm:$0xff]   ;;  %v643_v5 = vmov 1   ;;  %v568_v6 = vld [vmem:[%s819_s3 + $0x10] sm:$0xff]   ;;  %vm644_vm0 = vmmov 0   ;;  %vm424_vm4 = vcmask 25600  }
  0x15   :  { %516 = vmatprep.subr.bf16.mxu1 %v642_v1  ;;  %53 = vperm.xlu0 %564, %v48_v2   ;;  %v569_v7 = vld [vmem:[%s819_s3 + $0x18] sm:$0xff]   ;;  %v570_v8 = vld [vmem:[%s819_s3 + $0x20] sm:$0xff]   ;;  %v571_v10 = vld [vmem:[%s819_s3 + $0x28] sm:$0xff]   ;;  %v57_v19 = vshrl.u32 %v56_v18, 7 }
  0x16   :  { %497 = vmatpush3.bf16.msra.mxu0 %v566_v3  ;;  %512 = vmatprep.mubr.msk.bf16.mxu0 %vm644_vm0, %v642_v1  ;;  %v574_v9 = vld [vmem:[#allocation2] sm:$0xff]   ;;  %v575_v11 = vld [vmem:[#allocation2 + $0x8] sm:$0xff]   ;;  %v576_v12 = vld [vmem:[#allocation2 + $0x10] sm:$0xff]  }
  0x17   :  { %498 = vmatprep.subr.bf16.mxu0 %v642_v1  ;;  %532 = vmatprep.mubr.msk.bf16.mxu1 %vm644_vm0, %v642_v1  ;;  %v572_v13 = vld [vmem:[%s819_s3 + $0x30] sm:$0xff]   ;;  %v577_v14 = vld [vmem:[#allocation2 + $0x18] sm:$0xff]   ;;  %v578_v16 = vld [vmem:[#allocation2 + $0x20] sm:$0xff]   ;;  %v58_v22 = vsub.s32 0, %v57_v19  ;;  %v67_v24 = vsub.s32 1, %v57_v19 }
  0x18   :  { %517 = vmatpush3.bf16.msra.mxu1 %v574_v9  ;;  %v573_v15 = vld [vmem:[%s819_s3 + $0x38] sm:$0xff]   ;;  %v579_v17 = vld [vmem:[#allocation2 + $0x28] sm:$0xff]   ;;  %v49_v20 = vld [vmem:[%s817_s1] sm:$0x1] }
  0x19   :  { %565 = vset.pattern.permute.xlu0 %v643_v5  ;;  %518 = vmatprep.subr.bf16.mxu1 %v642_v1  ;;  %v50_v21 = vunpack.c.l.bf16 %v49_v20  ;;  %v441_v28 = vld [vmem:[%s818_s2] ss:$0 sm:$0xff]  ;;  %v580_v36 = vld [vmem:[#allocation2 + $0x30] sm:$0xff]   ;;  %v581_v37 = vld [vmem:[#allocation2 + $0x38] sm:$0xff]  }
  0x1a   :  { %62 = vperm.xlu0 %565, %v48_v2   ;;  %499 = vmatpush3.bf16.msra.mxu0 %v567_v4  ;;  %v582_v38 = vld [vmem:[%s823_s7] sm:$0xff]   ;;  %v583_v39 = vld [vmem:[%s823_s7 + $0x8] sm:$0xff]   ;;  %v584_v40 = vld [vmem:[%s823_s7 + $0x10] sm:$0xff]  }
  0x1b   :  { %500 = vmatprep.subr.bf16.mxu0 %v642_v1  ;;  %v59_v23 = vrot.slane %v50_v21, %v58_v22  ;;  %v68_v27 = vrot.slane %v50_v21, %v67_v24  ;;  %v585_v41 = vld [vmem:[%s823_s7 + $0x18] sm:$0xff]   ;;  %v586_v42 = vld [vmem:[%s823_s7 + $0x20] sm:$0xff]   ;;  %v587_v43 = vld [vmem:[%s823_s7 + $0x28] sm:$0xff]  }
  0x1c   :  { %519 = vmatpush3.bf16.msra.mxu1 %v575_v11  ;;  %v442_v44 = vld [vmem:[%s820_s4] ss:$0 sm:$0xff]  ;;  %v588_v53 = vld [vmem:[%s823_s7 + $0x30] sm:$0xff]   ;;  %v589_v54 = vld [vmem:[%s823_s7 + $0x38] sm:$0xff]   ;;  %s645_s7 = smov [#allocation5]  }
  0x1d   :  { %520 = vmatprep.subr.bf16.mxu1 %v642_v1  ;;  %v451_v55 = vld [vmem:[%s822_s6] ss:$0 sm:$0xff]  ;;  %s432_s17 = sshll.u32 %s645_s7, 4  ;;  %s433_s17 = int_to_ptr.vmem [resolvable:$true] %s432_s17 }
  0x1e   :  { %501 = vmatpush3.bf16.msra.mxu0 %v568_v6  ;;  %v460_v0 = vld [vmem:[%s824_s8] ss:$0 sm:$0xff]  ;;  %s612_s6 = scalar_lea.vmem %s433_s17, 32  ;;  %p617_p9 = scmp.lt.s32.totalorder %s433_s17, %s433_s17 }
  0x1f   :  { %502 = vmatprep.subr.bf16.mxu0 %v642_v1  ;;  %p613_p8 = scmp.ne.s32.totalorder %s433_s17, %s612_s6  ;;  %p618_p10 = scmp.lt.s32.totalorder %s612_s6, %s612_s6 }
  0x20   :  { %521 = vmatpush3.bf16.msra.mxu1 %v576_v12 }
  0x21   :  { %522 = vmatprep.subr.bf16.mxu1 %v642_v1  ;;  %p619_p11 = por %p618_p10, %p617_p9 }
  0x22   :  { %503 = vmatpush3.bf16.msra.mxu0 %v569_v7 }
  0x23   :  { %504 = vmatprep.subr.bf16.mxu0 %v642_v1  ;;  %p620_p12 = pnand %p619_p11, %p613_p8 }
  0x24   :  { %523 = vmatpush3.bf16.msra.mxu1 %v577_v14 }
  0x25   :  { %524 = vmatprep.subr.bf16.mxu1 %v642_v1 }
  0x26   :  { %505 = vmatpush3.bf16.msra.mxu0 %v570_v8 }
  0x27   :  { %506 = vmatprep.subr.bf16.mxu0 %v642_v1 }
  0x28   :  { %525 = vmatpush3.bf16.msra.mxu1 %v578_v16 }
  0x29   :  { %526 = vmatprep.subr.bf16.mxu1 %v642_v1 }
  0x2a   :  { %507 = vmatpush3.bf16.msra.mxu0 %v571_v10 }
  0x2b   :  { %508 = vmatprep.subr.bf16.mxu0 %v642_v1 }
  0x2c   :  { %527 = vmatpush3.bf16.msra.mxu1 %v579_v17 }
  0x2d   :  { %528 = vmatprep.subr.bf16.mxu1 %v642_v1 }
  0x2e   :  { %509 = vmatpush3.bf16.msra.mxu0 %v572_v13 }
  0x2f   :  { %510 = vmatprep.subr.bf16.mxu0 %v642_v1 }
  0x30   :  { %529 = vmatpush3.bf16.msra.mxu1 %v580_v36 }
  0x31   :  { %530 = vmatprep.subr.bf16.mxu1 %v642_v1 }
  0x32   :  { %511 = vmatpush3.bf16.msra.mxu0 %v573_v15 }
  0x33   :  { %536 = vmatprep.subr.bf16.mxu0 %v642_v1 }
  0x34   :  { %531 = vmatpush3.bf16.msra.mxu1 %v581_v37 }
  0x94   :  { %v54_v25 = vpop.permute.xlu0 %53 }
  0x95   :  { %v60_v26 = vmul.f32 %v59_v23, %v54_v25 }
  0x97   :  { %v77_v30 = vadd.f32 %v441_v28, %v60_v26 }
  0x99   :  { %v63_v29 = vpop.permute.xlu0 %62 }
  0x9a   :  { %v69_v31 = vmul.f32 %v68_v27, %v63_v29 }
  0x9c   :  { %v78_v32 = vadd.f32 %v77_v30, %v69_v31 }
  0x9e   :  { %v80_v33 = vmul.f32 0.01, %v78_v32  ;;  %vm79_vm1 = vcmp.gt.f32.partialorder %v78_v32, 0.0 }
  0xa0   :  { %v81_v34 = vsel %vm79_vm1, %v78_v32, %v80_v33 }
  0xa1   :  { %v82_v35 = vpack.c.bf16 %v81_v34, %v81_v34 }
  0xa3   :  { %513 = vmatmul.mubr.bf16.vlgmr.msra.gmra.mrb[0].mxu0 %v82_v35 }
  0xa4   :  { %552 = vmatprep.mubr.msk.bf16.mxu0 %vm644_vm0, %v642_v1  ;;  %537 = vmatpush3.bf16.msra.mxu0 %v582_v38 }
  0xa5   :  { %538 = vmatprep.subr.bf16.mxu0 %v642_v1 }
  0xa8   :  { %539 = vmatpush3.bf16.msra.mxu0 %v583_v39 }
  0xa9   :  { %540 = vmatprep.subr.bf16.mxu0 %v642_v1 }
  0xac   :  { %541 = vmatpush3.bf16.msra.mxu0 %v584_v40 }
  0xad   :  { %542 = vmatprep.subr.bf16.mxu0 %v642_v1 }
  0xb0   :  { %543 = vmatpush3.bf16.msra.mxu0 %v585_v41 }
  0xb1   :  { %544 = vmatprep.subr.bf16.mxu0 %v642_v1 }
  0xb4   :  { %545 = vmatpush3.bf16.msra.mxu0 %v586_v42 }
  0xb5   :  { %546 = vmatprep.subr.bf16.mxu0 %v642_v1 }
  0xb8   :  { %547 = vmatpush3.bf16.msra.mxu0 %v587_v43 }
  0xb9   :  { %548 = vmatprep.subr.bf16.mxu0 %v642_v1 }
  0xbc   :  { %549 = vmatpush3.bf16.msra.mxu0 %v588_v53 }
  0xbd   :  { %550 = vmatprep.subr.bf16.mxu0 %v642_v1 }
  0xc0   :  { %551 = vmatpush3.bf16.msra.mxu0 %v589_v54 }
 0x176   :  { %v188_v45 = vpop.f32.mrb[0].mxu0 }
 0x177   :  { %v189_v46 = vadd.f32 %v442_v44, %v188_v45  ;;  %v514_v47 = vpop.f32.mrb[1].mxu0 }
 0x178   :  { %v191_v48 = vpop.f32.mrb[2].mxu0 }
 0x179   :  { %vm194_vm2 = vcmp.gt.f32.partialorder %v189_v46, 0.0  ;;  %v195_v49 = vmul.f32 0.01, %v189_v46  ;;  %v515_v50 = vpop.f32.mrb[3].mxu0 }
 0x17b   :  { %v196_v51 = vsel %vm194_vm2, %v189_v46, %v195_v49 }
 0x17c   :  { %v197_v52 = vpack.c.bf16 %v196_v51, %v196_v51 }
 0x17e   :  { %533 = vmatmul.mubr.bf16.vlgmr.msra.gmra.mrb[0].mxu1 %v197_v52 }
 0x251   :  { %v303_v56 = vpop.f32.mrb[0].mxu1 }
 0x252   :  { %v304_v57 = vadd.f32 %v451_v55, %v303_v56  ;;  %v534_v58 = vpop.f32.mrb[1].mxu1 }
 0x253   :  { %v306_v59 = vpop.f32.mrb[2].mxu1 }
 0x254   :  { %vm309_vm3 = vcmp.gt.f32.partialorder %v304_v57, 0.0  ;;  %v310_v60 = vmul.f32 0.01, %v304_v57  ;;  %v535_v61 = vpop.f32.mrb[3].mxu1 }
 0x256   :  { %v311_v62 = vsel %vm309_vm3, %v304_v57, %v310_v60 }
 0x257   :  { %v312_v63 = vpack.c.bf16 %v311_v62, %v311_v62 }
 0x259   :  { %553 = vmatmul.mubr.bf16.vlgmr.msra.gmra.mrb[4].mxu0 %v312_v63 }
 0x32c   :  { %v418_v1 = vpop.f32.mrb[4].mxu0 }
 0x32d   :  { %v419_v2 = vadd.f32 %v460_v0, %v418_v1  ;;  %v554_v3 = vpop.f32.mrb[5].mxu0 }
 0x32e   :  { %v421_v4 = vpop.f32.mrb[6].mxu0 }
 0x32f   :  { %v555_v5 = vpop.f32.mrb[7].mxu0  ;;  %425 = vst.msk [vmem:[#allocation5] sm:$0x3] %vm424_vm4, %v419_v2 }
 0x330   :  { %623 = shalt.err (!%p620_p12)
}
 0x331   :  { %s624_s8 = scalar_lea.hbm %s825_s9, 32 }
 0x332   :  { %p625_p13 = scmp.ne.s32.totalorder %s825_s9, %s624_s8  ;;  %p628_p0 = scmp.lt.u32.totalorder %s624_s8, %s825_s9 }
 0x334   :  { %p630_p1 = pnand %p628_p0, %p625_p13 }
 0x336   :  { %633 = shalt.err (!%p630_p1)
}
 0x337   :  { %435 = dma.vmem_to_hbm [thread:$0]  %s433_s17, 32, %s825_s9, [#allocation4]  }
 0x338   :  { %636 = dma.done.wait [#allocation4], 32  }
 0x339   :  { %637 = vsyncadd [#allocation4], 4294967264 }
 0x33a   :  { %439 = vsyncpa [#allocation3], 1 }
 0x33b   :  { %440 = vsyncpa [#allocation4], 1 }

</bundles_post_ra>
